<compile_context>
chip_gen: v7x
topology: tpu7x:2x2x1
jax: 0.10.0
libtpu: 0.0.40
codegen_flags: <defaults>
</compile_context>

<pallas_src>
import jax
import jax.numpy as jnp
from jax import lax
from jax.experimental import pallas as pl
from jax.experimental.pallas import tpu as pltpu

BN_EPS = 1e-5


def context_gating_kernel(x_full_ref, x_tile_ref, x1_ref, wt_ref, b_ref,
                          g1_ref, be1_ref, g2_ref, be2_ref, o_ref):
    # fc for this output-feature tile: weight already [Din, Dtile] (transposed
    # in the wrapper), operands in native dtype -> MXU fast path, f32 accum.
    x2 = jnp.dot(x_full_ref[...], wt_ref[...],
                 preferred_element_type=jnp.float32)
    x2 = x2 + b_ref[...].astype(jnp.float32)

    # BatchNorm2 on fc output (training-mode: biased batch statistics).
    m2 = jnp.mean(x2, axis=0, keepdims=True)
    c2 = x2 - m2
    v2 = jnp.mean(c2 * c2, axis=0, keepdims=True)
    x2n = c2 * lax.rsqrt(v2 + BN_EPS) * g2_ref[...].astype(jnp.float32) \
        + be2_ref[...].astype(jnp.float32)

    # BatchNorm1 on x1 (same feature tile).
    x1 = x1_ref[...].astype(jnp.float32)
    m1 = jnp.mean(x1, axis=0, keepdims=True)
    c1 = x1 - m1
    v1 = jnp.mean(c1 * c1, axis=0, keepdims=True)
    x1n = c1 * lax.rsqrt(v1 + BN_EPS) * g1_ref[...].astype(jnp.float32) \
        + be1_ref[...].astype(jnp.float32)

    # t = BN1(x1) + BN2(fc(x));  GLU(cat((x, t), 1), dim=1) == x * sigmoid(t)
    t = x1n + x2n
    o_ref[...] = (x_tile_ref[...].astype(jnp.float32)
                  * jax.nn.sigmoid(t)).astype(o_ref.dtype)


def context_gating_reasoning(x, x1, w, b, gamma1, beta1, gamma2, beta2,
                             *, feature_tile=128):
    """x, x1: [N, D]; w: [D, D] (PyTorch layout); b/gammas/betas: [D] -> [N, D]."""
    n, d = x.shape
    assert x1.shape == (n, d) and w.shape == (d, d) and b.shape == (d,)

    # Lane-dense feature tiles (multiples of 128) when possible; the full
    # batch stays resident per tile because BN needs batch statistics.
    td = feature_tile if d % feature_tile == 0 else d
    grid = (d // td,)

    w_t = w.T  # transpose once at the XLA level; kernel sees [Din, Dout_tile]
    row = lambda v: v.reshape(1, d)
    b2, g1, be1, g2, be2 = map(row, (b, gamma1, beta1, gamma2, beta2))

    full_spec = pl.BlockSpec((n, d), lambda j: (0, 0))
    tile_spec = pl.BlockSpec((n, td), lambda j: (0, j))
    wt_spec = pl.BlockSpec((d, td), lambda j: (0, j))
    vec_spec = pl.BlockSpec((1, td), lambda j: (0, j))

    itemsize = jnp.dtype(x.dtype).itemsize
    cost = pl.CostEstimate(
        flops=2 * n * d * d + 14 * n * d,
        transcendentals=n * d,                      # sigmoid
        bytes_accessed=(4 * n * d + d * d + 5 * d) * itemsize,
    )

    return pl.pallas_call(
        context_gating_kernel,
        out_shape=jax.ShapeDtypeStruct((n, d), x.dtype),
        grid_spec=pl.GridSpec(
            grid=grid,
            in_specs=[full_spec, tile_spec, tile_spec, wt_spec,
                      vec_spec, vec_spec, vec_spec, vec_spec, vec_spec],
            out_specs=tile_spec,
        ),
        compiler_params=pltpu.CompilerParams(
            dimension_semantics=("parallel",),
        ),
        cost_estimate=cost,
    )(x, x, x1, w_t, b2, g1, be1, g2, be2)


if __name__ == "__main__":
    # Small shapes consistent with the module: batch=16, dimension=256
    batch, dim = 16, 256

    key = jax.random.PRNGKey(0)
    kx, kx1, kw, kb, kg1, kb1, kg2, kb2 = jax.random.split(key, 8)

    x = jax.random.normal(kx, (batch, dim), dtype=jnp.float32)
    x1 = jax.random.normal(kx1, (batch, dim), dtype=jnp.float32)

    # nn.Linear default init: uniform(-1/sqrt(in_features), 1/sqrt(in_features))
    bound = 1.0 / (dim ** 0.5)
    w = jax.random.uniform(kw, (dim, dim), minval=-bound, maxval=bound,
                           dtype=jnp.float32)
    b = jax.random.uniform(kb, (dim,), minval=-bound, maxval=bound,
                           dtype=jnp.float32)

    # BatchNorm affine params (defaults are gamma=1, beta=0; perturbed slightly
    # to exercise the affine path).
    gamma1 = 1.0 + 0.1 * jax.random.normal(kg1, (dim,), dtype=jnp.float32)
    beta1 = 0.1 * jax.random.normal(kb1, (dim,), dtype=jnp.float32)
    gamma2 = 1.0 + 0.1 * jax.random.normal(kg2, (dim,), dtype=jnp.float32)
    beta2 = 0.1 * jax.random.normal(kb2, (dim,), dtype=jnp.float32)

    out = context_gating_reasoning(x, x1, w, b, gamma1, beta1, gamma2, beta2)
    jax.block_until_ready(out)

    # Pure-JAX reference (same math as the PyTorch forward, training-mode BN).
    def bn_train(v, g, be, eps=BN_EPS):
        m = v.mean(axis=0, keepdims=True)
        var = ((v - m) ** 2).mean(axis=0, keepdims=True)   # biased variance
        return (v - m) / jnp.sqrt(var + eps) * g + be

    x2_ref = x @ w.T + b
    t_ref = bn_train(x1, gamma1, beta1) + bn_train(x2_ref, gamma2, beta2)
    ref = x * jax.nn.sigmoid(t_ref)          # F.glu(cat((x, t), 1), 1)

    assert out.shape == (batch, dim)
    assert jnp.allclose(out, ref, atol=1e-4, rtol=1e-4), float(
        jnp.max(jnp.abs(out - ref)))

    # TODO(synk): BatchNorm running-mean/var buffer updates (training side
    # effect, momentum=0.1) are not materialized; forward output is unaffected.
    print("KERNEL_OK")
</pallas_src>

<mosaic_0001>
module attributes {stable_mosaic.version = 11 : i64} {
  func.func @context_gating_kernel(%arg0: i32, %arg1: memref<16x256xf32, #tpu.memory_space<vmem>>, %arg2: memref<16x128xf32, #tpu.memory_space<vmem>>, %arg3: memref<16x128xf32, #tpu.memory_space<vmem>>, %arg4: memref<256x128xf32, #tpu.memory_space<vmem>>, %arg5: memref<1x128xf32, #tpu.memory_space<vmem>>, %arg6: memref<1x128xf32, #tpu.memory_space<vmem>>, %arg7: memref<1x128xf32, #tpu.memory_space<vmem>>, %arg8: memref<1x128xf32, #tpu.memory_space<vmem>>, %arg9: memref<1x128xf32, #tpu.memory_space<vmem>>, %arg10: memref<16x128xf32, #tpu.memory_space<vmem>>) attributes {dimension_semantics = [#tpu.dimension_semantics<parallel>], iteration_bounds = array<i64: 2>, scalar_prefetch = 0 : i64, scratch_operands = 0 : i64, tpu.core_type = #tpu.core_type<tc>, window_params = [{pipeline_mode = #tpu.pipeline_mode<synchronous>, transform_indices = @transform_0, window_bounds = array<i64: 16, 256>}, {transform_indices = @transform_1, window_bounds = array<i64: 16, 128>}, {transform_indices = @transform_2, window_bounds = array<i64: 16, 128>}, {transform_indices = @transform_3, window_bounds = array<i64: 256, 128>}, {transform_indices = @transform_4, window_bounds = array<i64: 1, 128>}, {transform_indices = @transform_5, window_bounds = array<i64: 1, 128>}, {transform_indices = @transform_6, window_bounds = array<i64: 1, 128>}, {transform_indices = @transform_7, window_bounds = array<i64: 1, 128>}, {transform_indices = @transform_8, window_bounds = array<i64: 1, 128>}, {transform_indices = @transform_9, window_bounds = array<i64: 16, 128>}]} {
    %c0 = arith.constant 0 : index
    %c0_0 = arith.constant 0 : index
    %0 = vector.load %arg1[%c0, %c0_0] : memref<16x256xf32, #tpu.memory_space<vmem>>, vector<16x256xf32>
    %c0_1 = arith.constant 0 : index
    %c0_2 = arith.constant 0 : index
    %1 = vector.load %arg4[%c0_1, %c0_2] : memref<256x128xf32, #tpu.memory_space<vmem>>, vector<256x128xf32>
    %cst = arith.constant dense<0.000000e+00> : vector<16x128xf32>
    %2 = tpu.matmul %0, %1, %cst {dimension_numbers = #tpu.dot_dimension_numbers<[1], [0], [0], [1], [0, 0, 1, 1], [], []>} : vector<16x256xf32>, vector<256x128xf32>, vector<16x128xf32> -> vector<16x128xf32>
    %c0_3 = arith.constant 0 : index
    %c0_4 = arith.constant 0 : index
    %3 = vector.load %arg5[%c0_3, %c0_4] : memref<1x128xf32, #tpu.memory_space<vmem>>, vector<1x128xf32>
    %4 = vector.broadcast %3 : vector<1x128xf32> to vector<16x128xf32>
    %5 = arith.addf %2, %4 : vector<16x128xf32>
    %cst_5 = arith.constant dense<0.000000e+00> : vector<128xf32>
    %6 = vector.multi_reduction <add>, %5, %cst_5 [0] : vector<16x128xf32> to vector<128xf32>
    %7 = vector.shape_cast %6 : vector<128xf32> to vector<1x128xf32>
    %cst_6 = arith.constant 1.600000e+01 : f32
    %8 = vector.broadcast %cst_6 : f32 to vector<1x128xf32>
    %9 = arith.divf %7, %8 : vector<1x128xf32>
    %10 = vector.broadcast %9 : vector<1x128xf32> to vector<16x128xf32>
    %11 = arith.subf %5, %10 : vector<16x128xf32>
    %12 = arith.mulf %11, %11 : vector<16x128xf32>
    %cst_7 = arith.constant dense<0.000000e+00> : vector<128xf32>
    %13 = vector.multi_reduction <add>, %12, %cst_7 [0] : vector<16x128xf32> to vector<128xf32>
    %14 = vector.shape_cast %13 : vector<128xf32> to vector<1x128xf32>
    %cst_8 = arith.constant 1.600000e+01 : f32
    %15 = vector.broadcast %cst_8 : f32 to vector<1x128xf32>
    %16 = arith.divf %14, %15 : vector<1x128xf32>
    %cst_9 = arith.constant 9.99999974E-6 : f32
    %17 = vector.broadcast %cst_9 : f32 to vector<1x128xf32>
    %18 = arith.addf %16, %17 : vector<1x128xf32>
    %19 = math.rsqrt %18 : vector<1x128xf32>
    %20 = vector.broadcast %19 : vector<1x128xf32> to vector<16x128xf32>
    %21 = arith.mulf %11, %20 : vector<16x128xf32>
    %c0_10 = arith.constant 0 : index
    %c0_11 = arith.constant 0 : index
    %22 = vector.load %arg8[%c0_10, %c0_11] : memref<1x128xf32, #tpu.memory_space<vmem>>, vector<1x128xf32>
    %23 = vector.broadcast %22 : vector<1x128xf32> to vector<16x128xf32>
    %24 = arith.mulf %21, %23 : vector<16x128xf32>
    %c0_12 = arith.constant 0 : index
    %c0_13 = arith.constant 0 : index
    %25 = vector.load %arg9[%c0_12, %c0_13] : memref<1x128xf32, #tpu.memory_space<vmem>>, vector<1x128xf32>
    %26 = vector.broadcast %25 : vector<1x128xf32> to vector<16x128xf32>
    %27 = arith.addf %24, %26 : vector<16x128xf32>
    %c0_14 = arith.constant 0 : index
    %c0_15 = arith.constant 0 : index
    %28 = vector.load %arg3[%c0_14, %c0_15] : memref<16x128xf32, #tpu.memory_space<vmem>>, vector<16x128xf32>
    %cst_16 = arith.constant dense<0.000000e+00> : vector<128xf32>
    %29 = vector.multi_reduction <add>, %28, %cst_16 [0] : vector<16x128xf32> to vector<128xf32>
    %30 = vector.shape_cast %29 : vector<128xf32> to vector<1x128xf32>
    %cst_17 = arith.constant 1.600000e+01 : f32
    %31 = vector.broadcast %cst_17 : f32 to vector<1x128xf32>
    %32 = arith.divf %30, %31 : vector<1x128xf32>
    %33 = vector.broadcast %32 : vector<1x128xf32> to vector<16x128xf32>
    %34 = arith.subf %28, %33 : vector<16x128xf32>
    %35 = arith.mulf %34, %34 : vector<16x128xf32>
    %cst_18 = arith.constant dense<0.000000e+00> : vector<128xf32>
    %36 = vector.multi_reduction <add>, %35, %cst_18 [0] : vector<16x128xf32> to vector<128xf32>
    %37 = vector.shape_cast %36 : vector<128xf32> to vector<1x128xf32>
    %cst_19 = arith.constant 1.600000e+01 : f32
    %38 = vector.broadcast %cst_19 : f32 to vector<1x128xf32>
    %39 = arith.divf %37, %38 : vector<1x128xf32>
    %cst_20 = arith.constant 9.99999974E-6 : f32
    %40 = vector.broadcast %cst_20 : f32 to vector<1x128xf32>
    %41 = arith.addf %39, %40 : vector<1x128xf32>
    %42 = math.rsqrt %41 : vector<1x128xf32>
    %43 = vector.broadcast %42 : vector<1x128xf32> to vector<16x128xf32>
    %44 = arith.mulf %34, %43 : vector<16x128xf32>
    %c0_21 = arith.constant 0 : index
    %c0_22 = arith.constant 0 : index
    %45 = vector.load %arg6[%c0_21, %c0_22] : memref<1x128xf32, #tpu.memory_space<vmem>>, vector<1x128xf32>
    %46 = vector.broadcast %45 : vector<1x128xf32> to vector<16x128xf32>
    %47 = arith.mulf %44, %46 : vector<16x128xf32>
    %c0_23 = arith.constant 0 : index
    %c0_24 = arith.constant 0 : index
    %48 = vector.load %arg7[%c0_23, %c0_24] : memref<1x128xf32, #tpu.memory_space<vmem>>, vector<1x128xf32>
    %49 = vector.broadcast %48 : vector<1x128xf32> to vector<16x128xf32>
    %50 = arith.addf %47, %49 : vector<16x128xf32>
    %51 = arith.addf %50, %27 : vector<16x128xf32>
    %c0_25 = arith.constant 0 : index
    %c0_26 = arith.constant 0 : index
    %52 = vector.load %arg2[%c0_25, %c0_26] : memref<16x128xf32, #tpu.memory_space<vmem>>, vector<16x128xf32>
    %53 = arith.negf %51 : vector<16x128xf32>
    %54 = math.exp %53 : vector<16x128xf32>
    %cst_27 = arith.constant 1.000000e+00 : f32
    %55 = vector.broadcast %cst_27 : f32 to vector<16x128xf32>
    %56 = arith.addf %55, %54 : vector<16x128xf32>
    %57 = arith.divf %55, %56 : vector<16x128xf32>
    %58 = arith.mulf %52, %57 : vector<16x128xf32>
    %c0_28 = arith.constant 0 : index
    %c0_29 = arith.constant 0 : index
    %59 = vector.load %arg10[%c0_28, %c0_29] : memref<16x128xf32, #tpu.memory_space<vmem>>, vector<16x128xf32>
    tpu.vector_store %arg10[%c0_28, %c0_29], %58 {strides = array<i32>} : memref<16x128xf32, #tpu.memory_space<vmem>>, vector<16x128xf32>,
    return
  }
  func.func @transform_0(%arg0: i32) -> (i32, i32) {
    %c0_i32 = arith.constant 0 : i32
    %c0_i32_0 = arith.constant 0 : i32
    %c0_i32_1 = arith.constant 0 : i32
    return %c0_i32, %c0_i32_0 : i32, i32
  }
  func.func @transform_1(%arg0: i32) -> (i32, i32) {
    %c0_i32 = arith.constant 0 : i32
    %c0_i32_0 = arith.constant 0 : i32
    return %c0_i32, %arg0 : i32, i32
  }
  func.func @transform_2(%arg0: i32) -> (i32, i32) {
    %c0_i32 = arith.constant 0 : i32
    %c0_i32_0 = arith.constant 0 : i32
    return %c0_i32, %arg0 : i32, i32
  }
  func.func @transform_3(%arg0: i32) -> (i32, i32) {
    %c0_i32 = arith.constant 0 : i32
    %c0_i32_0 = arith.constant 0 : i32
    return %c0_i32, %arg0 : i32, i32
  }
  func.func @transform_4(%arg0: i32) -> (i32, i32) {
    %c0_i32 = arith.constant 0 : i32
    %c0_i32_0 = arith.constant 0 : i32
    return %c0_i32, %arg0 : i32, i32
  }
  func.func @transform_5(%arg0: i32) -> (i32, i32) {
    %c0_i32 = arith.constant 0 : i32
    %c0_i32_0 = arith.constant 0 : i32
    return %c0_i32, %arg0 : i32, i32
  }
  func.func @transform_6(%arg0: i32) -> (i32, i32) {
    %c0_i32 = arith.constant 0 : i32
    %c0_i32_0 = arith.constant 0 : i32
    return %c0_i32, %arg0 : i32, i32
  }
  func.func @transform_7(%arg0: i32) -> (i32, i32) {
    %c0_i32 = arith.constant 0 : i32
    %c0_i32_0 = arith.constant 0 : i32
    return %c0_i32, %arg0 : i32, i32
  }
  func.func @transform_8(%arg0: i32) -> (i32, i32) {
    %c0_i32 = arith.constant 0 : i32
    %c0_i32_0 = arith.constant 0 : i32
    return %c0_i32, %arg0 : i32, i32
  }
  func.func @transform_9(%arg0: i32) -> (i32, i32) {
    %c0_i32 = arith.constant 0 : i32
    %c0_i32_0 = arith.constant 0 : i32
    return %c0_i32, %arg0 : i32, i32
  }
}

</mosaic_0001>

<bundles_post_ra>
// kernel: tpu_custom_call.1
= control target key start
LH: loop header
LB: loop body
LE: loop exit
PB: predicated region body
PF: predicated region fallthrough
CT: control target
= control target key end

     0   :  { %s1748_s0 = inlined_call_operand.hbm [shape: f32[16,256], index: 0, kind: input, shape index: {}]   ;;  %s1749_s1 = inlined_call_operand.hbm [shape: f32[16,256], index: 1, kind: input, shape index: {}]   ;;  %s1750_s2 = inlined_call_operand.hbm [shape: f32[16,256], index: 2, kind: input, shape index: {}]   ;;  %s1751_s3 = inlined_call_operand.hbm [shape: f32[256,256], index: 3, kind: input, shape index: {}]   ;;  %s1752_s4 = inlined_call_operand.vmem [shape: f32[1,256], index: 4, kind: input, shape index: {}]   ;;  %s1753_s5 = inlined_call_operand.vmem [shape: f32[1,256], index: 5, kind: input, shape index: {}]   ;;  %s1754_s6 = inlined_call_operand.vmem [shape: f32[1,256], index: 6, kind: input, shape index: {}]   ;;  %s1755_s7 = inlined_call_operand.vmem [shape: f32[1,256], index: 7, kind: input, shape index: {}]   ;;  %s1756_s8 = inlined_call_operand.vmem [shape: f32[1,256], index: 8, kind: input, shape index: {}]   ;;  %s1757_s9 = inlined_call_operand.hbm [shape: f32[16,256], index: 9, kind: output, shape index: {}]  }
   0x1   :  { %1782 = sst [smem:[#allocation22_spill]] %s1749_s1 }
   0x2   :  { %1783 = sst [smem:[#allocation23_spill]] %s1750_s2 }
   0x3   :  { %1784 = sst [smem:[#allocation24_spill]] %s1755_s7 }
   0x4   :  { %1785 = sst [smem:[#allocation25_spill]] %s1756_s8 }
   0x5   :  { %1786 = sst [smem:[#allocation26_spill]] %s1757_s9 }
   0x6   :  { %14 = vsyncpa [#allocation3], 0 }
   0x7   :  { %15 = vsyncpa [#allocation6], 0 }
   0x8   :  { %17 = vsyncpa [#allocation6 + $0x1], 0 }
   0x9   :  { %18 = vsyncpa [#allocation9], 0 }
   0xa   :  { %20 = vsyncpa [#allocation9 + $0x1], 0 }
   0xb   :  { %21 = vsyncpa [#allocation4], 0 }
   0xc   :  { %23 = vsyncpa [#allocation4 + $0x1], 0  ;;  %s1376_s30 = smov 0   ;;  %s1378_s10 = smov 0  }
   0xd   :  { %s1380_s11 = smov 0   ;;  %s1382_s12 = smov 0  }
   0xe LB: > { %1787 = sst [smem:[#allocation15_spill]] %s1300_s30  ;;  %s1397_s13 = sadd.s32 1, %s1312_s12   ;;  %s1312_s12 = sphi %s1382_s12, %s1826_s12   ;;  %s1308_s11 = sphi %s1380_s11, %s1828_s11   ;;  %s1304_s10 = sphi %s1378_s10, %s1830_s10   ;;  %s1300_s30 = sphi %s1376_s30, %s1829_s30  }
   0xf   : > { %1788 = sst [smem:[#allocation16_spill]] %s1308_s11  ;;  %s57_s14 = sadd.s32 1, %s1308_s11 }
  0x10   : > { %1789 = sst [smem:[#allocation17_spill]] %s1312_s12  ;;  %s54_s15 = ssub.s32 %s1312_s12, %s1397_s13 }
  0x11   : > { %1790 = sst [smem:[#allocation18_spill]] %s1397_s13  ;;  %p1758_p0 = scmp.ne.s32.totalorder %s1308_s11, %s1304_s10 }
  0x12   : > { %p55_p1 = scmp.eq.s32.totalorder %s54_s15, 0  ;;  %p65_p2 = scmp.eq.s32.totalorder %s1312_s12, 0 }
  0x13   : > { %p1065_p5 = scmp.lt.s32.totalorder %s1312_s12, 2  ;;  %s315_s17 = sand.u32 1, %s1312_s12  }
  0x14   : > { %s1407_s16 = scalar_select %p55_p1, %s1308_s11, %s57_s14  }
  0x15   : > { %p66_p4 = por %p65_p2, %p1758_p0  ;;  %s1415_s18 = sand.u32 1, %s1308_s11  }
  0x16   : > { %1791 = sst [smem:[#allocation19_spill]] %s1407_s16  ;;  %s925_s19 = sshll.u32 %s1415_s18, 4 }
  0x17   : > { %s1419_s20 = sshll.u32 %s1312_s12, 7  ;;  %s1792_s1 = sld [smem:[#allocation22_spill]] }
  0x18   : > { %s319_s24 = scalar_lea.vmem [#allocation5], %s925_s19  ;;  %p1431_p6 = pnand %p1065_p5, %p66_p4 }
  0x19   : > { %s325_s25 = sshll.u32 %s319_s24, 4  ;;  %s1435_s27 = scalar_lea.sflag [#allocation6], %s315_s17  ;;  %s1429_s25 = int_to_ptr.vmem [resolvable:$true] %s325_s25 }
  0x1a   : > { %s1793_s26 = scalar_select %p1431_p6, 1, 0 }
  0x1b   : > { %p1441_p8 = pneg %p1431_p6 }
  0x1d   : > { %s1425_s23 = scalar_lea.hbm %s1792_s1, %s1419_s20  ;;  %s1125_s21 = scalar_lea.hbm %s1792_s1, 512 }
  0x1e   : > { %s1120_s28 = scalar_lea.hbm %s1425_s23, 256  ;;  %p1126_p11 = scmp.lt.u32.totalorder %s1425_s23, %s1792_s1 }
  0x1f   : > { %p1121_p7 = scmp.ne.s32.totalorder %s1425_s23, %s1120_s28  ;;  %p1127_p12 = scmp.lt.u32.totalorder %s1125_s21, %s1120_s28 }
  0x20   : > { %s1794_s29 = scalar_select %p1441_p8, 1, 0 }
  0x21   : > { %p1123_p9 = pnand %p1441_p8, %p1121_p7  ;;  %p1128_p13 = por %p1127_p12, %p1126_p11 }
  0x22   : > { %p1129_p1 = scmp.lt.u32.totalorder %s1120_s28, %s1425_s23 }
  0x23   : > { %p1124_p10 = pneg %p1123_p9 }
  0x24   : > { %p1130_p2 = por %p1129_p1, %p1128_p13 }
  0x26   : > { %p1131_p4 = pnand %p1130_p2, %p1124_p10 }
  0x28   : > { %1134 = shalt.err (!%p1131_p4)
}
  0x29   : > { %s1135_s17 = scalar_lea.vmem %s1429_s25, 256  ;;  %s1314_s14 = smov [#allocation5]  }
  0x2a   : > { %p1136_p5 = scmp.ne.s32.totalorder %s1429_s25, %s1135_s17  ;;  %s1140_s15 = sshll.u32 %s1314_s14, 4  ;;  %s1141_s15 = int_to_ptr.vmem [resolvable:$false] %s1140_s15 }
  0x2b   : > { %s1142_s22 = scalar_lea.vmem %s1141_s15, 512  ;;  %p1143_p3 = scmp.lt.s32.totalorder %s1429_s25, %s1141_s15 }
  0x2c   : > { %p1138_p7 = pnand %p1136_p5, %p1441_p8  ;;  %p1144_p0 = scmp.lt.s32.totalorder %s1142_s22, %s1135_s17 }
  0x2e   : > { %p1139_p9 = pneg %p1138_p7  ;;  %p1145_p11 = por %p1144_p0, %p1143_p3 }
  0x30   : > { %p1146_p12 = pnand %p1145_p11, %p1139_p9 }
  0x32   : > { %1149 = shalt.err (!%p1146_p12)
}
  0x33   : > { %s1759_s28 = smov 256   ;;  %s1761_s21 = smov 128  }
  0x34   : > { %s1763_s24 = smov 8   ;;  %s339_s17 = scalar_lea.vmem [#allocation7], %s925_s19 }
  0x35   : > { %1053 = dma.hbm_to_vmem [thread:$0]  (!%p1431_p6), %s1425_s23, 256, %s1429_s25, %s1435_s27, %s1759_s28, %s1761_s21, %s1763_s24  }
  0x36   : > { %s345_s14 = sshll.u32 %s339_s17, 4  ;;  %s1473_s15 = sadd.s32 4294967295, %s1312_s12   ;;  %s1470_s14 = int_to_ptr.vmem [resolvable:$true] %s345_s14 }
  0x37   : > { %s921_s22 = sadd.s32 4294967294, %s1312_s12   ;;  %p70_p0 = scmp.ne.s32.totalorder %s1304_s10, %s1300_s30 }
  0x38   : > { %p1770_p3 = scmp.eq.s32.totalorder %s1473_s15, 0  ;;  %p276_p10 = scmp.eq.s32.totalorder %s1473_s15, 1 }
  0x39   : > { %p282_p13 = scmp.eq.s32.totalorder %s921_s22, 1  ;;  %p922_p2 = scmp.ge.s32.totalorder %s1312_s12, 1 }
  0x3a   : > { %p1482_p1 = por %p1770_p3, %p70_p0  ;;  %p1796_p4 = scmp.ne.s32.totalorder %s1308_s11, %s1304_s10 }
  0x3b   : > { %p1494_p7 = por %p282_p13, %p70_p0  ;;  %p289_p9 = scmp.lt.s32.totalorder %s1312_s12, 3 }
  0x3c   : > { %s1795_s23 = scalar_select %p1482_p1, 1, 0 }
  0x3d   : > { %p1490_p5 = por %p276_p10, %p1796_p4  ;;  %p1499_p11 = pnand %p922_p2, %p289_p9 }
  0x3e   : > { %s1799_s25 = scalar_select %p1494_p7, 1, 0 }
  0x3f   : > { %s1797_s19 = scalar_select %p1490_p5, 1, 0 }
  0x40   : > { %1800 = sst [smem:[#allocation21_spill]] %s1799_s25  ;;  %s1318_s22 = smov [#allocation2]  }
  0x41   : > { %1798 = sst [smem:[#allocation20_spill]] %s1797_s19  ;;  %s301_s28 = sshll.u32 %s1318_s22, 4  ;;  %s1503_s28 = int_to_ptr.vmem [resolvable:$true] %s301_s28 }
  0x42   : > { %s1801_s17 = scalar_select %p1499_p11, 1, 0 }
  0x43   : > { %s1802_s2 = sld [smem:[#allocation23_spill]] }
  0x49   : > { %s1509_s1 = scalar_lea.hbm %s1802_s2, %s1419_s20  ;;  %s1155_s13 = scalar_lea.hbm %s1802_s2, 512 }
  0x4a   : > { %s1150_s16 = scalar_lea.hbm %s1509_s1, 256  ;;  %p1156_p2 = scmp.lt.u32.totalorder %s1509_s1, %s1802_s2 }
  0x4b   : > { %p1151_p0 = scmp.ne.s32.totalorder %s1509_s1, %s1150_s16  ;;  %p1157_p4 = scmp.lt.u32.totalorder %s1155_s13, %s1150_s16 }
  0x4c   : > { %p1159_p3 = scmp.lt.u32.totalorder %s1150_s16, %s1509_s1 }
  0x4d   : > { %p1153_p10 = pnand %p1151_p0, %p1441_p8  ;;  %p1158_p9 = por %p1157_p4, %p1156_p2 }
  0x4f   : > { %p1154_p13 = pneg %p1153_p10  ;;  %p1160_p7 = por %p1159_p3, %p1158_p9 }
  0x51   : > { %p1161_p5 = pnand %p1160_p7, %p1154_p13 }
  0x53   : > { %1164 = shalt.err (!%p1161_p5)
}
  0x54   : > { %s1165_s21 = scalar_lea.vmem %s1470_s14, 256  ;;  %s1319_s11 = smov [#allocation7]  }
  0x55   : > { %p1166_p0 = scmp.ne.s32.totalorder %s1470_s14, %s1165_s21  ;;  %s1170_s24 = sshll.u32 %s1319_s11, 4  ;;  %s1171_s24 = int_to_ptr.vmem [resolvable:$false] %s1170_s24 }
  0x56   : > { %s1172_s12 = scalar_lea.vmem %s1171_s24, 512  ;;  %p1173_p1 = scmp.lt.s32.totalorder %s1470_s14, %s1171_s24 }
  0x57   : > { %p1168_p10 = pnand %p1166_p0, %p1441_p8  ;;  %p1174_p11 = scmp.lt.s32.totalorder %s1172_s12, %s1165_s21 }
  0x59   : > { %p1169_p12 = pneg %p1168_p10  ;;  %p1175_p2 = por %p1174_p11, %p1173_p1 }
  0x5b   : > { %p1176_p4 = pnand %p1175_p2, %p1169_p12 }
  0x5d   : > { %1179 = shalt.err (!%p1176_p4)
}
  0x5e   : > { %s1803_s13 = smov 8   ;;  %s1804_s16 = smov 128  }
  0x5f   : > { %s1805_s25 = smov 256   ;;  %p1806_p3 = scmp.eq.s32.totalorder %s1473_s15, 0 }
  0x60   : > { %1056 = dma.hbm_to_vmem [thread:$0]  (!%p1431_p6), %s1509_s1, 256, %s1470_s14, %s1435_s27, %s1805_s25, %s1804_s16, %s1803_s13  }
  0x61   : > { %p1807_p5 = scmp.ne.s32.totalorder %s1801_s17, 0  ;;  %s929_s21 = sshll.u32 %s1415_s18, 8 }
  0x62   : > { %s1552_s12 = scalar_lea.hbm %s1751_s3, %s1419_s20  ;;  %s359_s2 = scalar_lea.vmem [#allocation8], %s929_s21 }
  0x63   : > { %p1808_p7 = pneg %p1807_p5  ;;  %s365_s30 = sshll.u32 %s359_s2, 4  ;;  %s1577_s30 = int_to_ptr.vmem [resolvable:$true] %s365_s30 }
  0x64   : > { %s1180_s1 = scalar_lea.hbm %s1748_s0, 512 }
  0x65   : > { %p1543_p13 = pnand %p1808_p7, %p1806_p3  ;;  %p1181_p1 = scmp.ne.s32.totalorder %s1748_s0, %s1180_s1 }
  0x66   : > { %p1187_p0 = scmp.lt.u32.totalorder %s1180_s1, %s1748_s0 }
  0x67   : > { %p1182_p11 = pneg %p1543_p13 }
  0x69   : > { %p1183_p12 = pnand %p1182_p11, %p1181_p1 }
  0x6b   : > { %p1184_p9 = pneg %p1183_p12 }
  0x6d   : > { %p1189_p10 = pnand %p1187_p0, %p1184_p9 }
  0x6f   : > { %1192 = shalt.err (!%p1189_p10)
}
  0x70   : > { %s1193_s2 = scalar_lea.vmem %s1503_s28, 512  ;;  %p1201_p7 = scmp.lt.s32.totalorder %s1503_s28, %s1503_s28 }
  0x71   : > { %p1194_p2 = scmp.ne.s32.totalorder %s1503_s28, %s1193_s2  ;;  %p1202_p5 = scmp.lt.s32.totalorder %s1193_s2, %s1193_s2 }
  0x73   : > { %p1196_p4 = pnand %p1194_p2, %p1182_p11  ;;  %p1203_p6 = por %p1202_p5, %p1201_p7 }
  0x75   : > { %p1197_p3 = pneg %p1196_p4 }
  0x77   : > { %p1204_p8 = pnand %p1203_p6, %p1197_p3 }
  0x79   : > { %1207 = shalt.err (!%p1204_p8)
}
  0x7a   : > { %s1320_s9 = smov 16   ;;  %s356_s20 = scalar_lea.sflag [#allocation9], %s1415_s18 }
  0x7b   : > { %1049 = dma.hbm_to_vmem [thread:$0]  (!%p1543_p13), %s1748_s0, 512, %s1503_s28, [#allocation3], %s1805_s25, %s1805_s25, %s1320_s9  }
  0x7c   : > { %s1208_s19 = scalar_lea.hbm %s1552_s12, 4096  ;;  %p1810_p8 = scmp.ne.s32.totalorder %s1794_s29, 0 }
  0x7d   : > { %p1209_p6 = scmp.ne.s32.totalorder %s1552_s12, %s1208_s19  ;;  %s1213_s11 = scalar_lea.hbm %s1751_s3, 8192 }
  0x7e   : > { %p1214_p11 = scmp.lt.u32.totalorder %s1552_s12, %s1751_s3  ;;  %p1215_p12 = scmp.lt.u32.totalorder %s1213_s11, %s1208_s19 }
  0x7f   : > { %p1211_p5 = pnand %p1209_p6, %p1810_p8  ;;  %p1217_p0 = scmp.lt.u32.totalorder %s1208_s19, %s1552_s12 }
  0x80   : > { %p1216_p9 = por %p1215_p12, %p1214_p11 }
  0x81   : > { %p1212_p1 = pneg %p1211_p5 }
  0x82   : > { %p1218_p13 = por %p1217_p0, %p1216_p9 }
  0x84   : > { %p1219_p10 = pnand %p1218_p13, %p1212_p1 }
  0x86   : > { %1222 = shalt.err (!%p1219_p10)
}
  0x87   : > { %s1223_s28 = scalar_lea.vmem %s1577_s30, 4096  ;;  %s1321_s27 = smov [#allocation8]  }
  0x88   : > { %p1224_p2 = scmp.ne.s32.totalorder %s1577_s30, %s1223_s28  ;;  %s1228_s14 = sshll.u32 %s1321_s27, 4  ;;  %s1229_s14 = int_to_ptr.vmem [resolvable:$false] %s1228_s14 }
  0x89   : > { %s1230_s2 = scalar_lea.vmem %s1229_s14, 8192  ;;  %p1231_p7 = scmp.lt.s32.totalorder %s1577_s30, %s1229_s14 }
  0x8a   : > { %p1226_p4 = pnand %p1224_p2, %p1810_p8  ;;  %p1232_p6 = scmp.lt.s32.totalorder %s1230_s2, %s1223_s28 }
  0x8c   : > { %p1227_p3 = pneg %p1226_p4  ;;  %p1233_p5 = por %p1232_p6, %p1231_p7 }
  0x8e   : > { %p1234_p11 = pnand %p1233_p5, %p1227_p3 }
  0x90   : > { %1237 = shalt.err (!%p1234_p11)
}
  0x91   : > { %p1811_p1 = scmp.ne.s32.totalorder %s1793_s26, 0  ;;  %p1812_p8 = scmp.ne.s32.totalorder %s1801_s17, 0 }
  0x92   : > { %p1813_p12 = scmp.eq.s32.totalorder (!%p1812_p8), %s1473_s15, 0 }
  0x93   : > { %1059 = dma.hbm_to_vmem [thread:$0]  (!%p1811_p1), %s1552_s12, 4096, %s1577_s30, %s356_s20, %s1805_s25, %s1804_s16, %s1803_s13  }
  0x94   : > { %407 = sbr.rel (%p1812_p8) target bundleno = 518 (0x206), region = 56 }
  0x9b   : > { %1283 = dma.done.wait (%p1813_p12), [#allocation3], 512   ;;  %p1814_p9 = pmov %p1813_p12 }
  0x9c   : > { %s413_s26 = sand.u32 1, %s1473_s15   ;;  %s1614_s29 = sand.u32 1, %s1304_s10  }
  0x9d   : > { %1285 = vsyncadd (%p1814_p9), [#allocation3], 4294966784  ;;  %s1617_s18 = sshll.u32 %s1614_s29, 4  ;;  %s414_s30 = scalar_lea.sflag [#allocation6], %s413_s26 }
  0x9e   : > { %s417_s13 = scalar_lea.vmem [#allocation5], %s1617_s18  ;;  %p1815_p0 = scmp.ne.s32.totalorder %s1795_s23, 0 }
  0xa0   : > { %1287 = dma.done.wait (%p1815_p0), %s414_s30, 512  }
  0xa1   : > { %1289 = vsyncadd (%p1815_p0), %s414_s30, 4294966784  ;;  %s935_s17 = sshll.u32 %s1614_s29, 8  ;;  %s426_s16 = scalar_lea.vmem [#allocation7], %s1617_s18 }
  0xa2   : > { %s432_s25 = scalar_lea.sflag [#allocation9], %s1614_s29  ;;  %s1627_s12 = scalar_lea.vmem [#allocation8], %s935_s17 }
  0xa3   : > { %1291 = dma.done.wait (%p1815_p0), %s432_s25, 4096  }
  0xa4   : > { %1293 = vsyncadd (%p1815_p0), %s432_s25, 4294963200  ;;  %v530_v0 = vld [vmem:[%s1627_s12 + $0x80] sm:$0xff]  ;;  %v531_v1 = vld [vmem:[%s1627_s12 + $0x88] sm:$0xff]  ;;  %p495_p13 = scmp.lt.s32.totalorder %s1473_s15, 1  ;;  %s1816_s27 = sld [smem:[#allocation24_spill]] }
  0xa5   : > { %v514_v2 = vld [vmem:[%s1627_s12] sm:$0xff]  ;;  %v986_v3 = vpack.c.bf16 %v531_v1, %v530_v0  ;;  %v515_v4 = vld [vmem:[%s1627_s12 + $0x8] sm:$0xff]  ;;  %v532_v5 = vld [vmem:[%s1627_s12 + $0x90] sm:$0xff]  ;;  %s1817_s30 = sld [smem:[#allocation25_spill]]  ;;  %s1818_s25 = sld [smem:[#allocation20_spill]] }
  0xa6   : > { %v533_v6 = vld [vmem:[%s1627_s12 + $0x98] sm:$0xff]  ;;  %v988_v7 = vpack.c.bf16 %v515_v4, %v514_v2  ;;  %v516_v9 = vld [vmem:[%s1627_s12 + $0x10] sm:$0xff]  ;;  %v534_v11 = vld [vmem:[%s1627_s12 + $0xa0] sm:$0xff]  ;;  %s1671_s23 = scalar_select %p495_p13, %s1473_s15, 1 }
  0xa7   : > { %v990_v8 = vpack.c.bf16 %v533_v6, %v532_v5  ;;  %v517_v10 = vld [vmem:[%s1627_s12 + $0x18] sm:$0xff]  ;;  %987 = vmatprep.subr.bf16.mxu0 %v986_v3  ;;  %1018 = vmatprep.subr.bf16.mxu1 %v986_v3  ;;  %v535_v12 = vld [vmem:[%s1627_s12 + $0xa8] sm:$0xff]  ;;  %v518_v15 = vld [vmem:[%s1627_s12 + $0x20] sm:$0xff] }
  0xa8   : > { %989 = vmatpush3.bf16.msra.mxu0 %v988_v7  ;;  %1026 = vmatpush3.bf16.msra.mxu1 %v988_v7  ;;  %v992_v13 = vpack.c.bf16 %v517_v10, %v516_v9  ;;  %v994_v14 = vpack.c.bf16 %v535_v12, %v534_v11  ;;  %v519_v16 = vld [vmem:[%s1627_s12 + $0x28] sm:$0xff]  ;;  %v536_v17 = vld [vmem:[%s1627_s12 + $0xb0] sm:$0xff]  ;;  %v537_v18 = vld [vmem:[%s1627_s12 + $0xb8] sm:$0xff]  ;;  %s497_s8 = scalar_lea.vmem %s1752_s4, %s1671_s23  ;;  %s500_s22 = scalar_lea.vmem %s1753_s5, %s1671_s23 }
  0xa9   : > { %991 = vmatprep.subr.bf16.mxu0 %v990_v8  ;;  %1019 = vmatprep.subr.bf16.mxu1 %v990_v8  ;;  %v996_v19 = vpack.c.bf16 %v519_v16, %v518_v15  ;;  %v998_v20 = vpack.c.bf16 %v537_v18, %v536_v17  ;;  %v520_v21 = vld [vmem:[%s1627_s12 + $0x30] sm:$0xff]  ;;  %v521_v22 = vld [vmem:[%s1627_s12 + $0x38] sm:$0xff]  ;;  %v538_v23 = vld [vmem:[%s1627_s12 + $0xc0] sm:$0xff]  ;;  %s503_s24 = scalar_lea.vmem %s1754_s6, %s1671_s23 }
  0xaa   : > { %v539_v24 = vld [vmem:[%s1627_s12 + $0xc8] sm:$0xff]  ;;  %v513_v26 = vld [vmem:[#allocation2 + $0x18] sm:$0xff]  ;;  %v1000_v27 = vpack.c.bf16 %v521_v22, %v520_v21  ;;  %v522_v29 = vld [vmem:[%s1627_s12 + $0x40] sm:$0xff]  ;;  %s506_s14 = scalar_lea.vmem %s1816_s27, %s1671_s23 }
  0xab   : > { %v511_v25 = vld [vmem:[#allocation2 + $0x8] sm:$0xff]  ;;  %v1002_v28 = vpack.c.bf16 %v539_v24, %v538_v23  ;;  %v540_v31 = vld [vmem:[%s1627_s12 + $0xd0] sm:$0xff]  ;;  %v541_v32 = vld [vmem:[%s1627_s12 + $0xd8] sm:$0xff]  ;;  %622 = vmatprep.mubr.f32.mxu1 %v513_v26  ;;  %s509_s17 = scalar_lea.vmem %s1817_s30, %s1671_s23  ;;  %p1820_p2 = scmp.ne.s32.totalorder %s1818_s25, 0 }
  0xac   : > { %993 = vmatpush3.bf16.msra.mxu0 %v992_v13  ;;  %1027 = vmatpush3.bf16.msra.mxu1 %v992_v13  ;;  %v523_v30 = vld [vmem:[%s1627_s12 + $0x48] sm:$0xff]  ;;  %v1006_v34 = vpack.c.bf16 %v541_v32, %v540_v31  ;;  %v524_v35 = vld [vmem:[%s1627_s12 + $0x50] sm:$0xff]  ;;  %v525_v36 = vld [vmem:[%s1627_s12 + $0x58] sm:$0xff] }
  0xad   : > { %995 = vmatprep.subr.bf16.mxu0 %v994_v14  ;;  %1020 = vmatprep.subr.bf16.mxu1 %v994_v14  ;;  %v1004_v33 = vpack.c.bf16 %v523_v30, %v522_v29  ;;  %v542_v37 = vld [vmem:[%s1627_s12 + $0xe0] sm:$0xff]  ;;  %v543_v38 = vld [vmem:[%s1627_s12 + $0xe8] sm:$0xff]  ;;  %v1008_v39 = vpack.c.bf16 %v525_v36, %v524_v35  ;;  %v544_v43 = vld [vmem:[%s1627_s12 + $0xf0] sm:$0xff] }
  0xae   : > { %617 = vmatprep.mubr.f32.mxu0 %v511_v25  ;;  %v1010_v40 = vpack.c.bf16 %v543_v38, %v542_v37  ;;  %v526_v41 = vld [vmem:[%s1627_s12 + $0x60] sm:$0xff]  ;;  %v527_v42 = vld [vmem:[%s1627_s12 + $0x68] sm:$0xff]  ;;  %v545_v44 = vld [vmem:[%s1627_s12 + $0xf8] sm:$0xff] }
  0xaf   : > { %v1012_v45 = vpack.c.bf16 %v527_v42, %v526_v41  ;;  %v1014_v46 = vpack.c.bf16 %v545_v44, %v544_v43  ;;  %v528_v47 = vld [vmem:[%s1627_s12 + $0x70] sm:$0xff]  ;;  %v529_v48 = vld [vmem:[%s1627_s12 + $0x78] sm:$0xff]  ;;  %v510_v50 = vld [vmem:[#allocation2] sm:$0xff]  ;;  %s494_s12 = scalar_lea.vmem [#allocation10], %s1617_s18  ;;  %s1322_s18 = smov [#allocation10]  }
  0xb0   : > { %997 = vmatpush3.bf16.msra.mxu0 %v996_v19  ;;  %1028 = vmatpush3.bf16.msra.mxu1 %v996_v19  ;;  %v1016_v49 = vpack.c.bf16 %v529_v48, %v528_v47  ;;  %v512_v51 = vld [vmem:[#allocation2 + $0x10] sm:$0xff]  ;;  %v672_v53 = vld [vmem:[%s426_s16 + $0x8] sm:$0xff]  ;;  %v937_v5 = vld [vmem:[%s497_s8] ss:$0 sm:$0xff]  ;;  %s748_s23 = sshll.u32 %s494_s12, 4  ;;  %s1819_s8 = sld [smem:[#allocation26_spill]]  ;;  %s1704_s23 = int_to_ptr.vmem [resolvable:$true] %s748_s23 }
  0xb1   : > { %999 = vmatprep.subr.bf16.mxu0 %v998_v20  ;;  %1021 = vmatprep.subr.bf16.mxu1 %v998_v20  ;;  %v671_v52 = vld [vmem:[%s426_s16] sm:$0xff]  ;;  %s945_s16 = sshll.u32 %s1473_s15, 7  ;;  %s736_s15 = scalar_lea.sflag [#allocation4], %s1614_s29 }
  0xb2   : > { %v673_v54 = vadd.f32 %v672_v53, %v671_v52  ;;  %v940_v44 = vld [vmem:[%s500_s22] ss:$0 sm:$0xff]  ;;  %s1238_s19 = scalar_lea.vmem %s1704_s23, 256 }
  0xb3   : > { %v938_v48 = vld [vmem:[%s506_s14] ss:$0 sm:$0xff]  ;;  %p1239_p10 = scmp.ne.s32.totalorder %s1704_s23, %s1238_s19 }
  0xb4   : > { %1001 = vmatpush3.bf16.msra.mxu0 %v1000_v27  ;;  %1029 = vmatpush3.bf16.msra.mxu1 %v1000_v27  ;;  %v674_v55 = vrot.slane %v673_v54, 4 }
  0xb5   : > { %1003 = vmatprep.subr.bf16.mxu0 %v1002_v28  ;;  %1022 = vmatprep.subr.bf16.mxu1 %v1002_v28  ;;  %p1240_p4 = pnand %p1239_p10, %p1820_p2 }
  0xb6   : > { %v675_v56 = vadd.f32 %v674_v55, %v673_v54  ;;  %s1702_s20 = scalar_lea.hbm %s1819_s8, %s945_s16 }
  0xb7   : > { %p1241_p3 = pneg %p1240_p4 }
  0xb8   : > { %1005 = vmatpush3.bf16.msra.mxu0 %v1004_v33  ;;  %1030 = vmatpush3.bf16.msra.mxu1 %v1004_v33  ;;  %v676_v57 = vrot.slane %v675_v56, 2 }
  0xb9   : > { %1007 = vmatprep.subr.bf16.mxu0 %v1006_v34  ;;  %1023 = vmatprep.subr.bf16.mxu1 %v1006_v34 }
  0xba   : > { %v677_v58 = vadd.f32 %v676_v57, %v675_v56 }
  0xbc   : > { %1009 = vmatpush3.bf16.msra.mxu0 %v1008_v39  ;;  %1031 = vmatpush3.bf16.msra.mxu1 %v1008_v39  ;;  %v678_v59 = vrot.slane %v677_v58, 1 }
  0xbd   : > { %1011 = vmatprep.subr.bf16.mxu0 %v1010_v40  ;;  %1024 = vmatprep.subr.bf16.mxu1 %v1010_v40 }
  0xbe   : > { %v679_v60 = vadd.f32 %v678_v59, %v677_v58 }
  0xc0   : > { %1013 = vmatpush3.bf16.msra.mxu0 %v1012_v45  ;;  %1032 = vmatpush3.bf16.msra.mxu1 %v1012_v45  ;;  %v680_v61 = vmul.f32 0.0625, %v679_v60 }
  0xc1   : > { %1015 = vmatprep.subr.bf16.mxu0 %v1014_v46  ;;  %1025 = vmatprep.subr.bf16.mxu1 %v1014_v46 }
  0xc2   : > { %v681_v62 = vsub.f32 %v671_v52, %v680_v61  ;;  %v682_v63 = vsub.f32 %v672_v53, %v680_v61  ;;  %v939_v52 = vld [vmem:[%s509_s17] ss:$0 sm:$0xff] }
  0xc4   : > { %1017 = vmatpush3.bf16.msra.mxu0 %v1016_v49  ;;  %1033 = vmatpush3.bf16.msra.mxu1 %v1016_v49  ;;  %v683_v0 = vmul.f32 %v681_v62, %v681_v62  ;;  %v684_v1 = vmul.f32 %v682_v63, %v682_v63  ;;  %v941_v49 = vld [vmem:[%s503_s24] ss:$0 sm:$0xff] }
  0xc6   : > { %v685_v4 = vadd.f32 %v684_v1, %v683_v0 }
  0xc7   : > { %618 = vmatmul.mubr.f32.vlgmr.msra.gmra.mrb[0].mxu0 %v510_v50  ;;  %623 = vmatmul.mubr.f32.vlgmr.msra.gmra.mrb[0].mxu1 %v512_v51 }
  0xc8   : > { %v686_v12 = vrot.slane %v685_v4, 4 }
  0xca   : > { %v687_v15 = vadd.f32 %v686_v12, %v685_v4  ;;  %v718_v4 = vld [vmem:[%s417_s13 + $0x8] sm:$0xff] }
  0xcc   : > { %v688_v18 = vrot.slane %v687_v15, 2 }
  0xce   : > { %v689_v21 = vadd.f32 %v688_v18, %v687_v15 }
  0xd0   : > { %v690_v24 = vrot.slane %v689_v21, 1 }
  0xd2   : > { %v691_v29 = vadd.f32 %v690_v24, %v689_v21 }
  0xd4   : > { %v692_v32 = vmul.f32 0.0625, %v691_v29 }
  0xd6   : > { %v693_v35 = vadd.f32 1e-05, %v692_v32 }
  0xd8   : > { %1108 = vrsqrt.f32 %v693_v35 }
  0xe2   : > { %v1109_v41 = vpop.eup %1108 }
  0xe3   : > { %v695_v42 = vmul.f32 %v1109_v41, %v681_v62  ;;  %v696_v43 = vmul.f32 %v1109_v41, %v682_v63 }
  0xe5   : > { %v704_v45 = vmul.f32 %v940_v44, %v695_v42  ;;  %v705_v46 = vmul.f32 %v940_v44, %v696_v43 }
  0xe7   : > { %v713_v55 = vadd.f32 %v941_v49, %v704_v45  ;;  %v714_v56 = vadd.f32 %v941_v49, %v705_v46 }
 0x19a   : > { %v980_v2 = vpop.f32.mrb[0].mxu0  ;;  %v983_v3 = vpop.f32.mrb[0].mxu1 }
 0x19b   : > { %v981_v6 = vpop.f32.mrb[1].mxu0  ;;  %v984_v7 = vpop.f32.mrb[1].mxu1 }
 0x19c   : > { %v982_v8 = vadd.f32 %v981_v6, %v980_v2  ;;  %v985_v9 = vadd.f32 %v984_v7, %v983_v3  ;;  %v717_v3 = vld [vmem:[%s417_s13] sm:$0xff]  ;;  %s1242_s13 = sshll.u32 %s1322_s18, 4  ;;  %s1243_s13 = int_to_ptr.vmem [resolvable:$false] %s1242_s13 }
 0x19d   : > { %s1244_s22 = scalar_lea.vmem %s1243_s13, 512  ;;  %p1245_p7 = scmp.lt.s32.totalorder %s1704_s23, %s1243_s13 }
 0x19e   : > { %v620_v10 = vadd.f32 %v982_v8, %v937_v5  ;;  %v625_v11 = vadd.f32 %v985_v9, %v937_v5  ;;  %p1246_p6 = scmp.lt.s32.totalorder %s1244_s22, %s1238_s19 }
 0x1a0   : > { %v628_v13 = vadd.f32 %v625_v11, %v620_v10  ;;  %p1247_p5 = por %p1246_p6, %p1245_p7 }
 0x1a2   : > { %v629_v14 = vrot.slane %v628_v13, 4  ;;  %p1248_p11 = pnand %p1247_p5, %p1241_p3 }
 0x1a4   : > { %v630_v16 = vadd.f32 %v629_v14, %v628_v13 }
 0x1a6   : > { %v631_v17 = vrot.slane %v630_v16, 2 }
 0x1a8   : > { %v632_v19 = vadd.f32 %v631_v17, %v630_v16 }
 0x1aa   : > { %v633_v20 = vrot.slane %v632_v19, 1 }
 0x1ac   : > { %v634_v22 = vadd.f32 %v633_v20, %v632_v19 }
 0x1ae   : > { %v636_v23 = vmul.f32 0.0625, %v634_v22 }
 0x1b0   : > { %v637_v25 = vsub.f32 %v620_v10, %v636_v23  ;;  %v638_v26 = vsub.f32 %v625_v11, %v636_v23 }
 0x1b2   : > { %v639_v27 = vmul.f32 %v637_v25, %v637_v25  ;;  %v640_v28 = vmul.f32 %v638_v26, %v638_v26 }
 0x1b4   : > { %v641_v30 = vadd.f32 %v640_v28, %v639_v27 }
 0x1b6   : > { %v642_v31 = vrot.slane %v641_v30, 4 }
 0x1b8   : > { %v643_v33 = vadd.f32 %v642_v31, %v641_v30 }
 0x1ba   : > { %v644_v34 = vrot.slane %v643_v33, 2 }
 0x1bc   : > { %v645_v36 = vadd.f32 %v644_v34, %v643_v33 }
 0x1be   : > { %v646_v37 = vrot.slane %v645_v36, 1 }
 0x1c0   : > { %v647_v38 = vadd.f32 %v646_v37, %v645_v36 }
 0x1c2   : > { %v648_v39 = vmul.f32 0.0625, %v647_v38 }
 0x1c4   : > { %v649_v40 = vadd.f32 1e-05, %v648_v39 }
 0x1c6   : > { %1110 = vrsqrt.f32 %v649_v40 }
 0x1d0   : > { %v1111_v47 = vpop.eup %1110 }
 0x1d1   : > { %v651_v50 = vmul.f32 %v1111_v47, %v637_v25  ;;  %v652_v51 = vmul.f32 %v1111_v47, %v638_v26 }
 0x1d3   : > { %v660_v53 = vmul.f32 %v938_v48, %v651_v50  ;;  %v661_v54 = vmul.f32 %v938_v48, %v652_v51 }
 0x1d5   : > { %v669_v57 = vadd.f32 %v939_v52, %v660_v53  ;;  %v670_v58 = vadd.f32 %v939_v52, %v661_v54 }
 0x1d7   : > { %v715_v59 = vadd.f32 %v713_v55, %v669_v57  ;;  %v716_v60 = vadd.f32 %v714_v56, %v670_v58 }
 0x1d9   : > { %v942_v61 = vmul.f32 -1.442695, %v715_v59  ;;  %v943_v62 = vmul.f32 -1.442695, %v716_v60 }
 0x1db   : > { %1112 = vpow2.f32 %v942_v61 }
 0x1dc   : > { %1114 = vpow2.f32 %v943_v62 }
 0x1e5   : > { %v1113_v63 = vpop.eup %1112 }
 0x1e6   : > { %v1115_v0 = vpop.eup %1114  ;;  %v725_v1 = vadd.f32 1.0, %v1113_v63 }
 0x1e7   : > { %v726_v2 = vadd.f32 1.0, %v1115_v0 }
 0x1e8   : > { %1116 = vrcp.f32 %v725_v1 }
 0x1e9   : > { %1118 = vrcp.f32 %v726_v2 }
 0x1f2   : > { %v1117_v5 = vpop.eup %1116 }
 0x1f3   : > { %v1119_v6 = vpop.eup %1118  ;;  %v731_v7 = vmul.f32 %v1117_v5, %v717_v3 }
 0x1f4   : > { %v732_v8 = vmul.f32 %v1119_v6, %v718_v4 }
 0x1f5   : > { %733 = vst [vmem:[%s494_s12] sm:$0xff] %v731_v7 }
 0x1f6   : > { %734 = vst [vmem:[%s494_s12 + $0x8] sm:$0xff] %v732_v8 }
 0x1f7   : > { %1251 = shalt.err (!%p1248_p11)
}
 0x1f8   : > { %s1252_s21 = scalar_lea.hbm %s1702_s20, 256  ;;  %s1256_s1 = scalar_lea.hbm %s1819_s8, 512 }
 0x1f9   : > { %p1253_p1 = scmp.ne.s32.totalorder %s1702_s20, %s1252_s21  ;;  %p1257_p9 = scmp.lt.u32.totalorder %s1702_s20, %s1819_s8 }
 0x1fa   : > { %p1258_p0 = scmp.lt.u32.totalorder %s1256_s1, %s1252_s21  ;;  %p1260_p10 = scmp.lt.u32.totalorder %s1252_s21, %s1702_s20 }
 0x1fb   : > { %p1254_p8 = pnand %p1253_p1, %p1820_p2 }
 0x1fc   : > { %p1259_p13 = por %p1258_p0, %p1257_p9 }
 0x1fd   : > { %p1255_p12 = pneg %p1254_p8 }
 0x1fe   : > { %p1261_p4 = por %p1260_p10, %p1259_p13 }
 0x200   : > { %p1262_p3 = pnand %p1261_p4, %p1255_p12 }
 0x202   : > { %1265 = shalt.err (!%p1262_p3)
}
 0x203   : > { %s1323_s14 = smov 128   ;;  %s1324_s2 = smov 256  }
 0x204   : > { %s1325_s26 = smov 8  }
 0x205   : > { %1044 = dma.vmem_to_hbm [thread:$0]  (%p1820_p2), %s1704_s23, 256, %s1702_s20, %s736_s15, %s1323_s14, %s1324_s2, %s1325_s26  }
 0x206 PF: > { %s1821_s30 = sld [smem:[#allocation15_spill]]  ;;  %s1822_s17 = sld [smem:[#allocation21_spill]] }
 0x207   : > { %s1823_s16 = sld [smem:[#allocation17_spill]] }
 0x20c   : > { %s763_s12 = sand.u32 1, %s1821_s30   ;;  %p1824_p7 = scmp.ne.s32.totalorder %s1822_s17, 0 }
 0x20d   : > { %p1825_p6 = scmp.ge.s32.totalorder %s1823_s16, 2  ;;  %s764_s9 = scalar_lea.sflag [#allocation4], %s763_s12 }
 0x20f   : > { %p1061_p5 = pnand %p1825_p6, %p1824_p7 }
 0x211   : > { %1295 = dma.done.wait (!%p1061_p5), %s764_s9, 256  }
 0x212   : > { %1297 = vsyncadd (!%p1061_p5), %s764_s9, 4294967040  ;;  %s1826_s12 = sld [smem:[#allocation18_spill]]  ;;  %s1827_s7 = sld [smem:[#allocation16_spill]] }
 0x213   : > { %s1828_s11 = sld [smem:[#allocation19_spill]]  ;;  %s1829_s30 = smov %s1304_s10 }
 0x218   : > { %p26_p11 = scmp.ge.s32.totalorder %s1826_s12, 4   ;;  %s1830_s10 = smov %s1827_s7 }
 0x21a   :  { %28 = sbr.rel (!%p26_p11) target bundleno = 14 (0xe), region = 145 }
 0x221   :  { %769 = vsyncpa [#allocation3], 1 }
 0x222   :  { %771 = vsyncpa [#allocation3 + $0x1], 1 }
 0x223   :  { %772 = vsyncpa [#allocation6], 1 }
 0x224   :  { %774 = vsyncpa [#allocation6 + $0x1], 1 }
 0x225   :  { %775 = vsyncpa [#allocation9], 1 }
 0x226   :  { %777 = vsyncpa [#allocation9 + $0x1], 1 }
 0x227   :  { %778 = vsyncpa [#allocation4], 1 }
 0x228   :  { %780 = vsyncpa [#allocation4 + $0x1], 1 }

</bundles_post_ra>
